<compile_context>
chip_gen: v7x
topology: tpu7x:2x2x1
jax: 0.10.0
libtpu: 0.0.40
codegen_flags: <defaults>
</compile_context>

<pallas_src>
import jax
import jax.numpy as jnp
from jax.experimental import pallas as pl
from jax.experimental.pallas import tpu as pltpu

LANE = 128
VMEM_BUDGET = 24 * 1024 * 1024  # conservative: fits v7x (64 MiB phys / 32 MiB scoped)


def _round_up(x, m):
    return ((x + m - 1) // m) * m


def _pick_tm(m_rows, kp, cout_p, budget_bytes=VMEM_BUDGET):
    """Largest row tile that fits the VMEM budget and keeps >=2 grid steps."""
    for tm in (2048, 1024, 512, 256):
        conv_need = 2 * tm * kp * 2 + 2 * tm * cout_p * 4 + kp * cout_p * 2
        bn_need = 4 * tm * cout_p * 4
        if max(conv_need, bn_need) <= budget_bytes and m_rows >= 2 * tm:
            return tm
    return 128


def conv_stats_kernel(p_ref, w_ref, y_ref, stats_ref):
    # (TM, Kp) bf16 @ (Kp, Cout_p) bf16 -> f32 on the MXU. No bias: it cancels
    # exactly under training-mode BatchNorm (constant per-channel shift).
    y = jnp.dot(p_ref[...], w_ref[...], preferred_element_type=jnp.float32)
    y_ref[...] = y
    # Per-tile partial sums for the BN statistics. Padded rows of the patch
    # matrix are all-zero, so (with no bias) they contribute nothing; the
    # wrapper divides by the true row count M.
    s = jnp.sum(y, axis=0, keepdims=True)        # (1, Cout_p)
    ss = jnp.sum(y * y, axis=0, keepdims=True)   # (1, Cout_p)
    row = jax.lax.broadcasted_iota(jnp.int32, (8, y.shape[1]), 0)
    blk = jnp.where(row == 0, s, 0.0) + jnp.where(row == 1, ss, 0.0)
    stats_ref[...] = blk[None]                   # (1, 8, Cout_p)


def bn_relu_kernel(y_ref, scale_ref, shift_ref, o_ref):
    # Fused BatchNorm affine + ReLU (lane-dense, writes in place over y).
    o_ref[...] = jnp.maximum(y_ref[...] * scale_ref[...] + shift_ref[...], 0.0)


def conv_block_forward(x, w, b, gamma, beta, eps=1e-5):
    """x: (N, Cin, H, W) f32; w: (Cout, Cin, KH, KW); b/gamma/beta: (Cout,)."""
    del b  # conv bias cancels under training-mode BN: (y+b) - mean(y+b) == y - mean(y)
    N, Cin, H, W = x.shape
    Cout, _, KH, KW = w.shape
    ph, pw = KH // 2, KW // 2  # padding=(1,1) for the default 3x3 kernel, stride=(1,1)

    M = N * H * W
    K = KH * KW * Cin
    Kp = _round_up(K, LANE)
    Cout_p = _round_up(Cout, LANE)
    TM = _pick_tm(M, Kp, Cout_p)
    Mp = _round_up(M, TM)
    ntiles = Mp // TM

    # ---- im2col (glue), in bf16 to halve HBM traffic of the 9x patch stream ----
    x_nhwc = jnp.transpose(x, (0, 2, 3, 1)).astype(jnp.bfloat16)
    x_pad = jnp.pad(x_nhwc, ((0, 0), (ph, ph), (pw, pw), (0, 0)))
    taps = [x_pad[:, kh:kh + H, kw:kw + W, :] for kh in range(KH) for kw in range(KW)]
    patches = jnp.concatenate(taps, axis=-1).reshape(M, K)
    patches = jnp.pad(patches, ((0, Mp - M), (0, Kp - K)))          # (Mp, Kp) bf16

    w_mat = jnp.transpose(w, (2, 3, 1, 0)).reshape(K, Cout).astype(jnp.bfloat16)
    w_mat = jnp.pad(w_mat, ((0, Kp - K), (0, Cout_p - Cout)))       # (Kp, Cout_p) bf16

    # ---- conv as tiled matmul + fused per-tile BN partial sums (Pallas) ----
    y, stats = pl.pallas_call(
        conv_stats_kernel,
        out_shape=(
            jax.ShapeDtypeStruct((Mp, Cout_p), jnp.float32),
            jax.ShapeDtypeStruct((ntiles, 8, Cout_p), jnp.float32),
        ),
        grid_spec=pltpu.PrefetchScalarGridSpec(
            num_scalar_prefetch=0,
            grid=(ntiles,),
            in_specs=[
                pl.BlockSpec((TM, Kp), lambda i: (i, 0)),
                pl.BlockSpec((Kp, Cout_p), lambda i: (0, 0)),   # resident weights
            ],
            out_specs=[
                pl.BlockSpec((TM, Cout_p), lambda i: (i, 0)),
                pl.BlockSpec((1, 8, Cout_p), lambda i: (i, 0, 0)),
            ],
        ),
        compiler_params=pltpu.CompilerParams(
            dimension_semantics=("parallel",),
            vmem_limit_bytes=48 * 1024 * 1024,
        ),
    )(patches, w_mat)

    # ---- finish BatchNorm statistics (tiny reduction over ntiles partials) ----
    sum_y = jnp.sum(stats[:, 0, :], axis=0)      # (Cout_p,)
    sum_yy = jnp.sum(stats[:, 1, :], axis=0)     # (Cout_p,)
    mean = sum_y / M
    # f32 E[y^2]-mean^2; mean is ~0 without bias so cancellation is benign.
    var = jnp.maximum(sum_yy / M - mean * mean, 0.0)
    gamma_p = jnp.pad(gamma.astype(jnp.float32), (0, Cout_p - Cout))
    beta_p = jnp.pad(beta.astype(jnp.float32), (0, Cout_p - Cout))
    scale_row = gamma_p / jnp.sqrt(var + eps)
    shift_row = beta_p - mean * scale_row
    scale = scale_row.reshape(1, Cout_p)
    shift = shift_row.reshape(1, Cout_p)

    # ---- fused normalize + ReLU (Pallas), in place over y ----
    out = pl.pallas_call(
        bn_relu_kernel,
        out_shape=jax.ShapeDtypeStruct((Mp, Cout_p), jnp.float32),
        grid_spec=pltpu.PrefetchScalarGridSpec(
            num_scalar_prefetch=0,
            grid=(ntiles,),
            in_specs=[
                pl.BlockSpec((TM, Cout_p), lambda i: (i, 0)),
                pl.BlockSpec((1, Cout_p), lambda i: (0, 0)),
                pl.BlockSpec((1, Cout_p), lambda i: (0, 0)),
            ],
            out_specs=pl.BlockSpec((TM, Cout_p), lambda i: (i, 0)),
        ),
        compiler_params=pltpu.CompilerParams(
            dimension_semantics=("parallel",),
            vmem_limit_bytes=48 * 1024 * 1024,
        ),
        input_output_aliases={0: 0},   # reuse y's HBM buffer for the output
    )(y, scale, shift)

    out = out[:M, :Cout].reshape(N, H, W, Cout)
    return jnp.transpose(out, (0, 3, 1, 2))  # back to NCHW


def reference_forward(x, w, b, gamma, beta, eps=1e-5):
    y = jax.lax.conv_general_dilated(
        x, w, window_strides=(1, 1), padding=((1, 1), (1, 1)),
        dimension_numbers=("NCHW", "OIHW", "NCHW"),
        precision=jax.lax.Precision.HIGHEST,
    ) + b.reshape(1, -1, 1, 1)
    mean = jnp.mean(y, axis=(0, 2, 3), keepdims=True)
    var = jnp.mean((y - mean) ** 2, axis=(0, 2, 3), keepdims=True)
    yn = (y - mean) / jnp.sqrt(var + eps) * gamma.reshape(1, -1, 1, 1) \
        + beta.reshape(1, -1, 1, 1)
    return jnp.maximum(yn, 0.0)


if __name__ == "__main__":
    key = jax.random.PRNGKey(0)
    kx, kw, kb, kg, kbeta = jax.random.split(key, 5)

    N, Cin, Cout, H, W = 2, 4, 8, 16, 16
    x = jax.random.normal(kx, (N, Cin, H, W), dtype=jnp.float32)
    w = jax.random.normal(kw, (Cout, Cin, 3, 3), dtype=jnp.float32) * 0.1
    b = jax.random.normal(kb, (Cout,), dtype=jnp.float32) * 0.1
    gamma = 1.0 + 0.1 * jax.random.normal(kg, (Cout,), dtype=jnp.float32)
    beta = 0.1 * jax.random.normal(kbeta, (Cout,), dtype=jnp.float32)

    fwd = jax.jit(conv_block_forward)
    out = jax.block_until_ready(fwd(x, w, b, gamma, beta))

    ref = reference_forward(x, w, b, gamma, beta)
    assert out.shape == (N, Cout, H, W)
    # bf16 MXU operands (f32 accumulation) -> slightly looser tolerance than pure f32.
    assert jnp.allclose(out, ref, atol=2e-2, rtol=2e-2), "mismatch vs reference"

    print("KERNEL_OK")
</pallas_src>

<mosaic_0001>
module attributes {stable_mosaic.version = 11 : i64} {
  func.func @bn_relu_kernel(%arg0: i32, %arg1: memref<256x128xf32, #tpu.memory_space<vmem>>, %arg2: memref<1x128xf32, #tpu.memory_space<vmem>>, %arg3: memref<1x128xf32, #tpu.memory_space<vmem>>, %arg4: memref<256x128xf32, #tpu.memory_space<vmem>>) attributes {dimension_semantics = [#tpu.dimension_semantics<parallel>], iteration_bounds = array<i64: 2>, scalar_prefetch = 0 : i64, scratch_operands = 0 : i64, tpu.core_type = #tpu.core_type<tc>, window_params = [{transform_indices = @transform_0, window_bounds = array<i64: 256, 128>}, {pipeline_mode = #tpu.pipeline_mode<synchronous>, transform_indices = @transform_1, window_bounds = array<i64: 1, 128>}, {pipeline_mode = #tpu.pipeline_mode<synchronous>, transform_indices = @transform_2, window_bounds = array<i64: 1, 128>}, {transform_indices = @transform_3, window_bounds = array<i64: 256, 128>}]} {
    %c0 = arith.constant 0 : index
    %c0_0 = arith.constant 0 : index
    %0 = vector.load %arg1[%c0, %c0_0] : memref<256x128xf32, #tpu.memory_space<vmem>>, vector<256x128xf32>
    %c0_1 = arith.constant 0 : index
    %c0_2 = arith.constant 0 : index
    %1 = vector.load %arg2[%c0_1, %c0_2] : memref<1x128xf32, #tpu.memory_space<vmem>>, vector<1x128xf32>
    %2 = vector.broadcast %1 : vector<1x128xf32> to vector<256x128xf32>
    %3 = arith.mulf %0, %2 : vector<256x128xf32>
    %c0_3 = arith.constant 0 : index
    %c0_4 = arith.constant 0 : index
    %4 = vector.load %arg3[%c0_3, %c0_4] : memref<1x128xf32, #tpu.memory_space<vmem>>, vector<1x128xf32>
    %5 = vector.broadcast %4 : vector<1x128xf32> to vector<256x128xf32>
    %6 = arith.addf %3, %5 : vector<256x128xf32>
    %cst = arith.constant 0.000000e+00 : f32
    %7 = vector.broadcast %cst : f32 to vector<256x128xf32>
    %8 = arith.maximumf %6, %7 : vector<256x128xf32>
    %c0_5 = arith.constant 0 : index
    %c0_6 = arith.constant 0 : index
    %9 = vector.load %arg4[%c0_5, %c0_6] : memref<256x128xf32, #tpu.memory_space<vmem>>, vector<256x128xf32>
    tpu.vector_store %arg4[%c0_5, %c0_6], %8 {strides = array<i32>} : memref<256x128xf32, #tpu.memory_space<vmem>>, vector<256x128xf32>,
    return
  }
  func.func @transform_0(%arg0: i32) -> (i32, i32) {
    %c0_i32 = arith.constant 0 : i32
    %c0_i32_0 = arith.constant 0 : i32
    return %arg0, %c0_i32 : i32, i32
  }
  func.func @transform_1(%arg0: i32) -> (i32, i32) {
    %c0_i32 = arith.constant 0 : i32
    %c0_i32_0 = arith.constant 0 : i32
    %c0_i32_1 = arith.constant 0 : i32
    return %c0_i32, %c0_i32_0 : i32, i32
  }
  func.func @transform_2(%arg0: i32) -> (i32, i32) {
    %c0_i32 = arith.constant 0 : i32
    %c0_i32_0 = arith.constant 0 : i32
    %c0_i32_1 = arith.constant 0 : i32
    return %c0_i32, %c0_i32_0 : i32, i32
  }
  func.func @transform_3(%arg0: i32) -> (i32, i32) {
    %c0_i32 = arith.constant 0 : i32
    %c0_i32_0 = arith.constant 0 : i32
    return %arg0, %c0_i32 : i32, i32
  }
}

module attributes {stable_mosaic.version = 11 : i64} {
  func.func @conv_stats_kernel(%arg0: i32, %arg1: memref<256x128xbf16, #tpu.memory_space<vmem>>, %arg2: memref<128x128xbf16, #tpu.memory_space<vmem>>, %arg3: memref<256x128xf32, #tpu.memory_space<vmem>>, %arg4: memref<1x8x128xf32, #tpu.memory_space<vmem>>) attributes {dimension_semantics = [#tpu.dimension_semantics<parallel>], iteration_bounds = array<i64: 2>, scalar_prefetch = 0 : i64, scratch_operands = 0 : i64, tpu.core_type = #tpu.core_type<tc>, window_params = [{transform_indices = @transform_0, window_bounds = array<i64: 256, 128>}, {pipeline_mode = #tpu.pipeline_mode<synchronous>, transform_indices = @transform_1, window_bounds = array<i64: 128, 128>}, {transform_indices = @transform_2, window_bounds = array<i64: 256, 128>}, {transform_indices = @transform_3, window_bounds = array<i64: 1, 8, 128>}]} {
    %c0 = arith.constant 0 : index
    %c0_0 = arith.constant 0 : index
    %0 = vector.load %arg1[%c0, %c0_0] : memref<256x128xbf16, #tpu.memory_space<vmem>>, vector<256x128xbf16>
    %c0_1 = arith.constant 0 : index
    %c0_2 = arith.constant 0 : index
    %1 = vector.load %arg2[%c0_1, %c0_2] : memref<128x128xbf16, #tpu.memory_space<vmem>>, vector<128x128xbf16>
    %cst = arith.constant dense<0.000000e+00> : vector<256x128xf32>
    %2 = tpu.matmul %0, %1, %cst {dimension_numbers = #tpu.dot_dimension_numbers<[1], [0], [0], [1], [0, 0, 1, 1], [], []>} : vector<256x128xbf16>, vector<128x128xbf16>, vector<256x128xf32> -> vector<256x128xf32>
    %c0_3 = arith.constant 0 : index
    %c0_4 = arith.constant 0 : index
    %3 = vector.load %arg3[%c0_3, %c0_4] : memref<256x128xf32, #tpu.memory_space<vmem>>, vector<256x128xf32>
    tpu.vector_store %arg3[%c0_3, %c0_4], %2 {strides = array<i32>} : memref<256x128xf32, #tpu.memory_space<vmem>>, vector<256x128xf32>,
    %cst_5 = arith.constant dense<0.000000e+00> : vector<128xf32>
    %4 = vector.multi_reduction <add>, %2, %cst_5 [0] : vector<256x128xf32> to vector<128xf32>
    %5 = vector.shape_cast %4 : vector<128xf32> to vector<1x128xf32>
    %6 = arith.mulf %2, %2 : vector<256x128xf32>
    %cst_6 = arith.constant dense<0.000000e+00> : vector<128xf32>
    %7 = vector.multi_reduction <add>, %6, %cst_6 [0] : vector<256x128xf32> to vector<128xf32>
    %8 = vector.shape_cast %7 : vector<128xf32> to vector<1x128xf32>
    %9 = tpu.iota {dimensions = array<i32: 0>} : vector<8x128xi32>
    %c0_i32 = arith.constant 0 : i32
    %10 = vector.broadcast %c0_i32 : i32 to vector<8x128xi32>
    %11 = arith.cmpi eq, %9, %10 : vector<8x128xi32>
    %cst_7 = arith.constant 0.000000e+00 : f32
    %12 = vector.shape_cast %5 : vector<1x128xf32> to vector<1x128xf32>
    %13 = vector.broadcast %12 : vector<1x128xf32> to vector<8x128xf32>
    %14 = vector.broadcast %cst_7 : f32 to vector<8x128xf32>
    %15 = arith.select %11, %13, %14 : vector<8x128xi1>, vector<8x128xf32>
    %c1_i32 = arith.constant 1 : i32
    %16 = vector.broadcast %c1_i32 : i32 to vector<8x128xi32>
    %17 = arith.cmpi eq, %9, %16 : vector<8x128xi32>
    %cst_8 = arith.constant 0.000000e+00 : f32
    %18 = vector.shape_cast %8 : vector<1x128xf32> to vector<1x128xf32>
    %19 = vector.broadcast %18 : vector<1x128xf32> to vector<8x128xf32>
    %20 = vector.broadcast %cst_8 : f32 to vector<8x128xf32>
    %21 = arith.select %17, %19, %20 : vector<8x128xi1>, vector<8x128xf32>
    %22 = arith.addf %15, %21 : vector<8x128xf32>
    %23 = vector.shape_cast %22 : vector<8x128xf32> to vector<1x8x128xf32>
    %c0_9 = arith.constant 0 : index
    %c0_10 = arith.constant 0 : index
    %c0_11 = arith.constant 0 : index
    %24 = vector.load %arg4[%c0_9, %c0_10, %c0_11] : memref<1x8x128xf32, #tpu.memory_space<vmem>>, vector<1x8x128xf32>
    tpu.vector_store %arg4[%c0_9, %c0_10, %c0_11], %23 {strides = array<i32>} : memref<1x8x128xf32, #tpu.memory_space<vmem>>, vector<1x8x128xf32>,
    return
  }
  func.func @transform_0(%arg0: i32) -> (i32, i32) {
    %c0_i32 = arith.constant 0 : i32
    %c0_i32_0 = arith.constant 0 : i32
    return %arg0, %c0_i32 : i32, i32
  }
  func.func @transform_1(%arg0: i32) -> (i32, i32) {
    %c0_i32 = arith.constant 0 : i32
    %c0_i32_0 = arith.constant 0 : i32
    %c0_i32_1 = arith.constant 0 : i32
    return %c0_i32, %c0_i32_0 : i32, i32
  }
  func.func @transform_2(%arg0: i32) -> (i32, i32) {
    %c0_i32 = arith.constant 0 : i32
    %c0_i32_0 = arith.constant 0 : i32
    return %arg0, %c0_i32 : i32, i32
  }
  func.func @transform_3(%arg0: i32) -> (i32, i32, i32) {
    %c0_i32 = arith.constant 0 : i32
    %c0_i32_0 = arith.constant 0 : i32
    %c0_i32_1 = arith.constant 0 : i32
    return %arg0, %c0_i32, %c0_i32_0 : i32, i32, i32
  }
}

</mosaic_0001>

<bundles_post_ra>
// kernel: conv_block_forward.3
= control target key start
LH: loop header
LB: loop body
LE: loop exit
PB: predicated region body
PF: predicated region fallthrough
CT: control target
= control target key end

     0   :  { %s453_s12 = smov 0   ;;  %s643_s0 = inlined_call_operand.vmem [shape: f32[512,128], index: 0, kind: input, shape index: {}, may-alias: {0,3}]   ;;  %s644_s1 = inlined_call_operand.vmem [shape: f32[1,128], index: 1, kind: input, shape index: {}]   ;;  %s645_s2 = inlined_call_operand.vmem [shape: f32[1,128], index: 2, kind: input, shape index: {}]   ;;  %s646_s3 = inlined_call_operand.vmem [shape: f32[512,128], index: 3, kind: output, shape index: {}, may-alias: {0,3}]  }
   0x1 LB: > { %s404_s13 = sadd.s32 4294967295, %s431_s12   ;;  %p408_p0 = scmp.ge.s32.totalorder %s431_s12, 1  ;;  %s431_s12 = sphi %s453_s12, %s13_s12  }
   0x2   : > { %p138_p1 = scmp.lt.s32.totalorder %s431_s12, 3 }
   0x4   : > { %p139_p2 = pnand %p408_p0, %p138_p1 }
   0x5   : > { %s409_s14 = sshll.u32 (!%p139_p2), %s404_s13, 5  ;;  %v467_v0 = vld [vmem:[%s644_s1] ss:$0 sm:$0xff] (!%p139_p2) }
   0x6   : > { %142 = sbr.rel (%p139_p2) target bundleno = 46 (0x2e), region = 32  ;;  %p163_p3 = scmp.lt.s32.totalorder (!%p139_p2), %s409_s14, 63  ;;  %v479_v1 = vld [vmem:[%s645_s2] ss:$0 sm:$0xff] (!%p139_p2) }
   0xd   : > { %s648_s14 = smov (!%p163_p3, %s409_s14), 63 }
   0xe   : > { %s410_s15 = sshll.u32 %s648_s14, 3 }
   0xf   : > { %s474_s20 = scalar_lea.vmem %s643_s0, %s410_s15  ;;  %s521_s25 = scalar_lea.vmem %s646_s3, %s410_s15 }
  0x10   : > { %v174_v2 = vld [vmem:[%s474_s20] sm:$0xff]  ;;  %v175_v3 = vld [vmem:[%s474_s20 + $0x8] sm:$0xff]  ;;  %v176_v4 = vld [vmem:[%s474_s20 + $0x10] sm:$0xff] }
  0x11   : > { %v177_v5 = vld [vmem:[%s474_s20 + $0x18] sm:$0xff]  ;;  %v178_v6 = vld [vmem:[%s474_s20 + $0x20] sm:$0xff]  ;;  %v179_v7 = vld [vmem:[%s474_s20 + $0x28] sm:$0xff]  ;;  %v213_v8 = vmul.f32 %v467_v0, %v174_v2  ;;  %v214_v9 = vmul.f32 %v467_v0, %v175_v3  ;;  %v215_v10 = vmul.f32 %v467_v0, %v176_v4 }
  0x12   : > { %v180_v11 = vld [vmem:[%s474_s20 + $0x30] sm:$0xff]  ;;  %v181_v12 = vld [vmem:[%s474_s20 + $0x38] sm:$0xff]  ;;  %v216_v13 = vmul.f32 %v467_v0, %v177_v5  ;;  %v217_v14 = vmul.f32 %v467_v0, %v178_v6  ;;  %v218_v15 = vmul.f32 %v467_v0, %v179_v7  ;;  %v182_v20 = vld [vmem:[%s474_s20 + $0x40] sm:$0xff] }
  0x13   : > { %v252_v16 = vadd.f32 %v479_v1, %v213_v8  ;;  %v253_v17 = vadd.f32 %v479_v1, %v214_v9  ;;  %v254_v18 = vadd.f32 %v479_v1, %v215_v10  ;;  %v219_v19 = vmul.f32 %v467_v0, %v180_v11  ;;  %v183_v21 = vld [vmem:[%s474_s20 + $0x48] sm:$0xff]  ;;  %v184_v22 = vld [vmem:[%s474_s20 + $0x50] sm:$0xff]  ;;  %v185_v27 = vld [vmem:[%s474_s20 + $0x58] sm:$0xff] }
  0x14   : > { %v255_v23 = vadd.f32 %v479_v1, %v216_v13  ;;  %v256_v24 = vadd.f32 %v479_v1, %v217_v14  ;;  %v257_v25 = vadd.f32 %v479_v1, %v218_v15  ;;  %v220_v26 = vmul.f32 %v467_v0, %v181_v12  ;;  %v186_v28 = vld [vmem:[%s474_s20 + $0x60] sm:$0xff]  ;;  %v187_v29 = vld [vmem:[%s474_s20 + $0x68] sm:$0xff]  ;;  %v188_v34 = vld [vmem:[%s474_s20 + $0x70] sm:$0xff] }
  0x15   : > { %v284_v30 = vmax.f32 %v252_v16, 0.0  ;;  %v285_v31 = vmax.f32 %v253_v17, 0.0  ;;  %v286_v32 = vmax.f32 %v254_v18, 0.0  ;;  %v258_v33 = vadd.f32 %v479_v1, %v219_v19  ;;  %v189_v39 = vld [vmem:[%s474_s20 + $0x78] sm:$0xff]  ;;  %v190_v44 = vld [vmem:[%s474_s20 + $0x80] sm:$0xff]  ;;  %v191_v45 = vld [vmem:[%s474_s20 + $0x88] sm:$0xff] }
  0x16   : > { %v287_v35 = vmax.f32 %v255_v23, 0.0  ;;  %v288_v36 = vmax.f32 %v256_v24, 0.0  ;;  %v289_v37 = vmax.f32 %v257_v25, 0.0  ;;  %v259_v38 = vadd.f32 %v479_v1, %v220_v26  ;;  %v192_v46 = vld [vmem:[%s474_s20 + $0x90] sm:$0xff]  ;;  %v193_v47 = vld [vmem:[%s474_s20 + $0x98] sm:$0xff]  ;;  %v194_v48 = vld [vmem:[%s474_s20 + $0xa0] sm:$0xff] }
  0x17   : > { %v290_v40 = vmax.f32 %v258_v33, 0.0  ;;  %v221_v41 = vmul.f32 %v467_v0, %v182_v20  ;;  %v222_v42 = vmul.f32 %v467_v0, %v183_v21  ;;  %v223_v43 = vmul.f32 %v467_v0, %v184_v22  ;;  %v195_v49 = vld [vmem:[%s474_s20 + $0xa8] sm:$0xff]  ;;  %v196_v50 = vld [vmem:[%s474_s20 + $0xb0] sm:$0xff]  ;;  %v197_v51 = vld [vmem:[%s474_s20 + $0xb8] sm:$0xff] }
  0x18   : > { %v532_v52 = vld [vmem:[%s474_s20 + $0xc0] sm:$0xff]  ;;  %v535_v53 = vld [vmem:[%s474_s20 + $0xc8] sm:$0xff]  ;;  %v291_v54 = vmax.f32 %v259_v38, 0.0  ;;  %v224_v55 = vmul.f32 %v467_v0, %v185_v27  ;;  %v225_v56 = vmul.f32 %v467_v0, %v186_v28  ;;  %v226_v57 = vmul.f32 %v467_v0, %v187_v29  ;;  %v541_v58 = vld [vmem:[%s474_s20 + $0xd0] sm:$0xff] }
  0x19   : > { %v544_v59 = vld [vmem:[%s474_s20 + $0xd8] sm:$0xff]  ;;  %v547_v60 = vld [vmem:[%s474_s20 + $0xe0] sm:$0xff]  ;;  %v260_v61 = vadd.f32 %v479_v1, %v221_v41  ;;  %v261_v62 = vadd.f32 %v479_v1, %v222_v42  ;;  %v262_v63 = vadd.f32 %v479_v1, %v223_v43  ;;  %v227_v2 = vmul.f32 %v467_v0, %v188_v34  ;;  %v554_v3 = vld [vmem:[%s474_s20 + $0xe8] sm:$0xff] }
  0x1a   : > { %v557_v4 = vld [vmem:[%s474_s20 + $0xf0] sm:$0xff]  ;;  %v560_v5 = vld [vmem:[%s474_s20 + $0xf8] sm:$0xff]  ;;  %v263_v6 = vadd.f32 %v479_v1, %v224_v55  ;;  %v264_v7 = vadd.f32 %v479_v1, %v225_v56  ;;  %v265_v8 = vadd.f32 %v479_v1, %v226_v57  ;;  %v228_v9 = vmul.f32 %v467_v0, %v189_v39 }
  0x1b   : > { %316 = vst [vmem:[%s521_s25] sm:$0xff] %v284_v30  ;;  %317 = vst [vmem:[%s521_s25 + $0x8] sm:$0xff] %v285_v31  ;;  %v292_v10 = vmax.f32 %v260_v61, 0.0  ;;  %v293_v11 = vmax.f32 %v261_v62, 0.0  ;;  %v294_v12 = vmax.f32 %v262_v63, 0.0  ;;  %v266_v13 = vadd.f32 %v479_v1, %v227_v2 }
  0x1c   : > { %318 = vst [vmem:[%s521_s25 + $0x10] sm:$0xff] %v286_v32  ;;  %319 = vst [vmem:[%s521_s25 + $0x18] sm:$0xff] %v287_v35  ;;  %v295_v14 = vmax.f32 %v263_v6, 0.0  ;;  %v296_v15 = vmax.f32 %v264_v7, 0.0  ;;  %v297_v16 = vmax.f32 %v265_v8, 0.0  ;;  %v267_v17 = vadd.f32 %v479_v1, %v228_v9 }
  0x1d   : > { %320 = vst [vmem:[%s521_s25 + $0x20] sm:$0xff] %v288_v36  ;;  %321 = vst [vmem:[%s521_s25 + $0x28] sm:$0xff] %v289_v37  ;;  %v298_v18 = vmax.f32 %v266_v13, 0.0  ;;  %v229_v19 = vmul.f32 %v467_v0, %v190_v44  ;;  %v230_v20 = vmul.f32 %v467_v0, %v191_v45  ;;  %v231_v21 = vmul.f32 %v467_v0, %v192_v46 }
  0x1e   : > { %322 = vst [vmem:[%s521_s25 + $0x30] sm:$0xff] %v290_v40  ;;  %323 = vst [vmem:[%s521_s25 + $0x38] sm:$0xff] %v291_v54  ;;  %v299_v22 = vmax.f32 %v267_v17, 0.0  ;;  %v232_v23 = vmul.f32 %v467_v0, %v193_v47  ;;  %v233_v24 = vmul.f32 %v467_v0, %v194_v48  ;;  %v234_v25 = vmul.f32 %v467_v0, %v195_v49 }
  0x1f   : > { %324 = vst [vmem:[%s521_s25 + $0x40] sm:$0xff] %v292_v10  ;;  %325 = vst [vmem:[%s521_s25 + $0x48] sm:$0xff] %v293_v11  ;;  %v268_v26 = vadd.f32 %v479_v1, %v229_v19  ;;  %v269_v27 = vadd.f32 %v479_v1, %v230_v20  ;;  %v270_v28 = vadd.f32 %v479_v1, %v231_v21 }
  0x20   : > { %326 = vst [vmem:[%s521_s25 + $0x50] sm:$0xff] %v294_v12  ;;  %327 = vst [vmem:[%s521_s25 + $0x58] sm:$0xff] %v295_v14  ;;  %v235_v29 = vmul.f32 %v467_v0, %v196_v50  ;;  %v271_v30 = vadd.f32 %v479_v1, %v232_v23  ;;  %v272_v31 = vadd.f32 %v479_v1, %v233_v24 }
  0x21   : > { %328 = vst [vmem:[%s521_s25 + $0x60] sm:$0xff] %v296_v15  ;;  %329 = vst [vmem:[%s521_s25 + $0x68] sm:$0xff] %v297_v16  ;;  %v273_v32 = vadd.f32 %v479_v1, %v234_v25  ;;  %v236_v33 = vmul.f32 %v467_v0, %v197_v51  ;;  %v300_v34 = vmax.f32 %v268_v26, 0.0  ;;  %v301_v35 = vmax.f32 %v269_v27, 0.0 }
  0x22   : > { %330 = vst [vmem:[%s521_s25 + $0x70] sm:$0xff] %v298_v18  ;;  %331 = vst [vmem:[%s521_s25 + $0x78] sm:$0xff] %v299_v22  ;;  %v302_v36 = vmax.f32 %v270_v28, 0.0  ;;  %v274_v37 = vadd.f32 %v479_v1, %v235_v29  ;;  %v303_v38 = vmax.f32 %v271_v30, 0.0  ;;  %v304_v39 = vmax.f32 %v272_v31, 0.0 }
  0x23   : > { %v305_v40 = vmax.f32 %v273_v32, 0.0  ;;  %v275_v41 = vadd.f32 %v479_v1, %v236_v33  ;;  %332 = vst [vmem:[%s521_s25 + $0x80] sm:$0xff] %v300_v34  ;;  %333 = vst [vmem:[%s521_s25 + $0x88] sm:$0xff] %v301_v35  ;;  %v237_v43 = vmul.f32 %v467_v0, %v532_v52  ;;  %v238_v44 = vmul.f32 %v467_v0, %v535_v53 }
  0x24   : > { %334 = vst [vmem:[%s521_s25 + $0x90] sm:$0xff] %v302_v36  ;;  %v306_v42 = vmax.f32 %v274_v37, 0.0  ;;  %v239_v45 = vmul.f32 %v467_v0, %v541_v58  ;;  %335 = vst [vmem:[%s521_s25 + $0x98] sm:$0xff] %v303_v38  ;;  %v240_v47 = vmul.f32 %v467_v0, %v544_v59  ;;  %v241_v48 = vmul.f32 %v467_v0, %v547_v60 }
  0x25   : > { %336 = vst [vmem:[%s521_s25 + $0xa0] sm:$0xff] %v304_v39  ;;  %337 = vst [vmem:[%s521_s25 + $0xa8] sm:$0xff] %v305_v40  ;;  %v307_v46 = vmax.f32 %v275_v41, 0.0  ;;  %v242_v49 = vmul.f32 %v467_v0, %v554_v3  ;;  %v276_v50 = vadd.f32 %v479_v1, %v237_v43  ;;  %v277_v51 = vadd.f32 %v479_v1, %v238_v44 }
  0x26   : > { %338 = vst [vmem:[%s521_s25 + $0xb0] sm:$0xff] %v306_v42  ;;  %v278_v52 = vadd.f32 %v479_v1, %v239_v45  ;;  %v243_v53 = vmul.f32 %v467_v0, %v557_v4  ;;  %v279_v54 = vadd.f32 %v479_v1, %v240_v47  ;;  %v280_v55 = vadd.f32 %v479_v1, %v241_v48 }
  0x27   : > { %339 = vst [vmem:[%s521_s25 + $0xb8] sm:$0xff] %v307_v46  ;;  %v281_v56 = vadd.f32 %v479_v1, %v242_v49  ;;  %v244_v57 = vmul.f32 %v467_v0, %v560_v5  ;;  %v308_v58 = vmax.f32 %v276_v50, 0.0  ;;  %v309_v59 = vmax.f32 %v277_v51, 0.0 }
  0x28   : > { %v310_v60 = vmax.f32 %v278_v52, 0.0  ;;  %v282_v61 = vadd.f32 %v479_v1, %v243_v53  ;;  %v311_v62 = vmax.f32 %v279_v54, 0.0  ;;  %v312_v63 = vmax.f32 %v280_v55, 0.0 }
  0x29   : > { %v313_v2 = vmax.f32 %v281_v56, 0.0  ;;  %v283_v3 = vadd.f32 %v479_v1, %v244_v57  ;;  %340 = vst [vmem:[%s521_s25 + $0xc0] sm:$0xff] %v308_v58  ;;  %341 = vst [vmem:[%s521_s25 + $0xc8] sm:$0xff] %v309_v59 }
  0x2a   : > { %342 = vst [vmem:[%s521_s25 + $0xd0] sm:$0xff] %v310_v60  ;;  %v314_v4 = vmax.f32 %v282_v61, 0.0  ;;  %343 = vst [vmem:[%s521_s25 + $0xd8] sm:$0xff] %v311_v62 }
  0x2b   : > { %344 = vst [vmem:[%s521_s25 + $0xe0] sm:$0xff] %v312_v63  ;;  %345 = vst [vmem:[%s521_s25 + $0xe8] sm:$0xff] %v313_v2  ;;  %v315_v0 = vmax.f32 %v283_v3, 0.0 }
  0x2c   : > { %346 = vst [vmem:[%s521_s25 + $0xf0] sm:$0xff] %v314_v4 }
  0x2d   : > { %347 = vst [vmem:[%s521_s25 + $0xf8] sm:$0xff] %v315_v0 }
  0x2e PF: > { %s13_s12 = sadd.s32 1, %s431_s12  }
  0x2f   : > { %p10_p4 = scmp.ge.s32.totalorder %s13_s12, 4  }
  0x31   :  { %12 = sbr.rel (!%p10_p4) target bundleno = 1 (0x1), region = 62 }

// kernel: conv_block_forward.2
= control target key start
LH: loop header
LB: loop body
LE: loop exit
PB: predicated region body
PF: predicated region fallthrough
CT: control target
= control target key end

     0   :  { %s956_s12 = smov 0   ;;  %s1139_s0 = inlined_call_operand.vmem [shape: bf16[512,128], index: 0, kind: input, shape index: {}]   ;;  %s1140_s1 = inlined_call_operand.vmem [shape: bf16[128,128], index: 1, kind: input, shape index: {}]   ;;  %s1141_s2 = inlined_call_operand.vmem [shape: f32[512,128], index: 2, kind: output, shape index: {0}]   ;;  %s1142_s3 = inlined_call_operand.vmem [shape: f32[2,8,128], index: 3, kind: output, shape index: {1}]  }
   0x1 LB: > { %s962_s13 = sadd.s32 4294967295, %s934_s12   ;;  %p776_p0 = scmp.ge.s32.totalorder %s934_s12, 1  ;;  %s934_s12 = sphi %s956_s12, %s14_s12  }
   0x2   : > { %p141_p1 = scmp.lt.s32.totalorder %s934_s12, 3 }
   0x4   : > { %p142_p2 = pnand %p776_p0, %p141_p1 }
   0x5   : > { %v904_v0 = vld [vmem:[%s1140_s1] sm:$0xff] (!%p142_p2)   ;;  %s777_s16 = sshll.u32 (!%p142_p2), %s962_s13, 5  ;;  %v905_v1 = vld [vmem:[%s1140_s1 + $0x8] sm:$0xff] (!%p142_p2)   ;;  %v906_v2 = vld [vmem:[%s1140_s1 + $0x10] sm:$0xff] (!%p142_p2)   ;;  %p181_p4 = scmp.lt.s32.totalorder (!%p142_p2), %s962_s13, 1 }
   0x6   : > { %145 = sbr.rel (%p142_p2) target bundleno = 333 (0x14d), region = 28  ;;  %p170_p3 = scmp.lt.s32.totalorder (!%p142_p2), %s777_s16, 63  ;;  %832 = vmatprep.subr.bf16.mxu0 (!%p142_p2), %v904_v0  ;;  %880 = vmatprep.subr.bf16.mxu1 (!%p142_p2), %v904_v0  ;;  %v907_v3 = vld [vmem:[%s1140_s1 + $0x18] sm:$0xff] (!%p142_p2)   ;;  %v908_v5 = vld [vmem:[%s1140_s1 + $0x20] sm:$0xff] (!%p142_p2)   ;;  %v909_v6 = vld [vmem:[%s1140_s1 + $0x28] sm:$0xff] (!%p142_p2)  }
   0x7   : > { %833 = vmatpush3.bf16.msra.mxu0 (!%p142_p2), %v904_v0  ;;  %888 = vmatpush3.bf16.msra.mxu1 (!%p142_p2), %v904_v0  ;;  %v910_v8 = vld [vmem:[%s1140_s1 + $0x30] sm:$0xff] (!%p142_p2)   ;;  %v911_v9 = vld [vmem:[%s1140_s1 + $0x38] sm:$0xff] (!%p142_p2)  }
   0x8   : > { %834 = vmatprep.subr.bf16.mxu0 (!%p142_p2), %v905_v1  ;;  %881 = vmatprep.subr.bf16.mxu1 (!%p142_p2), %v905_v1 }
   0xb   : > { %835 = vmatpush3.bf16.msra.mxu0 (!%p142_p2), %v905_v1  ;;  %889 = vmatpush3.bf16.msra.mxu1 (!%p142_p2), %v905_v1 }
   0xc   : > { %836 = vmatprep.subr.bf16.mxu0 (!%p142_p2), %v906_v2  ;;  %882 = vmatprep.subr.bf16.mxu1 (!%p142_p2), %v906_v2 }
   0xd   : > { %s1144_s16 = smov (!%p170_p3, %s777_s16), 63  ;;  %s1146_s13 = smov (!%p181_p4, %s962_s13), 1 }
   0xe   : > { %s778_s21 = sshll.u32 %s1144_s16, 2  ;;  %s780_s8 = sshll.u32 %s1144_s16, 3 }
   0xf   : > { %s982_s24 = scalar_lea.vmem %s1139_s0, %s778_s21  ;;  %837 = vmatpush3.bf16.msra.mxu0 %v906_v2  ;;  %890 = vmatpush3.bf16.msra.mxu1 %v906_v2  ;;  %s1019_s11 = scalar_lea.vmem %s1141_s2, %s780_s8 }
  0x10   : > { %v912_v4 = vld [vmem:[%s982_s24] sm:$0xff]   ;;  %838 = vmatprep.subr.bf16.mxu0 %v907_v3  ;;  %883 = vmatprep.subr.bf16.mxu1 %v907_v3  ;;  %v913_v10 = vld [vmem:[%s982_s24 + $0x8] sm:$0xff]   ;;  %v914_v12 = vld [vmem:[%s982_s24 + $0x10] sm:$0xff]   ;;  %s781_s14 = sshll.u32 %s1146_s13, 3 }
  0x11   : > { %848 = vmatprep.mubr.bf16.mxu0 %v912_v4  ;;  %v920_v7 = vld [vmem:[%s982_s24 + $0x40] sm:$0xff]   ;;  %v921_v11 = vld [vmem:[%s982_s24 + $0x48] sm:$0xff]   ;;  %v922_v13 = vld [vmem:[%s982_s24 + $0x50] sm:$0xff]   ;;  %s184_s17 = scalar_lea.vmem %s1142_s3, %s781_s14 }
  0x12   : > { %864 = vmatprep.mubr.bf16.mxu1 %v920_v7  ;;  %v915_v14 = vld [vmem:[%s982_s24 + $0x18] sm:$0xff]   ;;  %v916_v16 = vld [vmem:[%s982_s24 + $0x20] sm:$0xff]   ;;  %v917_v18 = vld [vmem:[%s982_s24 + $0x28] sm:$0xff]  }
  0x13   : > { %839 = vmatpush3.bf16.msra.mxu0 %v907_v3  ;;  %891 = vmatpush3.bf16.msra.mxu1 %v907_v3  ;;  %v923_v15 = vld [vmem:[%s982_s24 + $0x58] sm:$0xff]   ;;  %v924_v17 = vld [vmem:[%s982_s24 + $0x60] sm:$0xff]   ;;  %v925_v19 = vld [vmem:[%s982_s24 + $0x68] sm:$0xff]  }
  0x14   : > { %840 = vmatprep.subr.bf16.mxu0 %v908_v5  ;;  %884 = vmatprep.subr.bf16.mxu1 %v908_v5  ;;  %v918_v20 = vld [vmem:[%s982_s24 + $0x30] sm:$0xff]   ;;  %v919_v22 = vld [vmem:[%s982_s24 + $0x38] sm:$0xff]  }
  0x15   : > { %v926_v21 = vld [vmem:[%s982_s24 + $0x70] sm:$0xff]   ;;  %v927_v23 = vld [vmem:[%s982_s24 + $0x78] sm:$0xff]  }
  0x17   : > { %841 = vmatpush3.bf16.msra.mxu0 %v908_v5  ;;  %892 = vmatpush3.bf16.msra.mxu1 %v908_v5 }
  0x18   : > { %842 = vmatprep.subr.bf16.mxu0 %v909_v6  ;;  %885 = vmatprep.subr.bf16.mxu1 %v909_v6 }
  0x1b   : > { %843 = vmatpush3.bf16.msra.mxu0 %v909_v6  ;;  %893 = vmatpush3.bf16.msra.mxu1 %v909_v6 }
  0x1c   : > { %844 = vmatprep.subr.bf16.mxu0 %v910_v8  ;;  %886 = vmatprep.subr.bf16.mxu1 %v910_v8 }
  0x1f   : > { %845 = vmatpush3.bf16.msra.mxu0 %v910_v8  ;;  %894 = vmatpush3.bf16.msra.mxu1 %v910_v8 }
  0x20   : > { %846 = vmatprep.subr.bf16.mxu0 %v911_v9  ;;  %887 = vmatprep.subr.bf16.mxu1 %v911_v9 }
  0x23   : > { %847 = vmatpush3.bf16.msra.mxu0 %v911_v9  ;;  %895 = vmatpush3.bf16.msra.mxu1 %v911_v9 }
  0x26   : > { %849 = vmatmul.mubr.bf16.vlgmr.msra.gmra.mrb[0].mxu0 %v913_v10  ;;  %865 = vmatmul.mubr.bf16.vlgmr.msra.gmra.mrb[0].mxu1 %v921_v11 }
  0x27   : > { %852 = vmatprep.mubr.bf16.mxu0 %v914_v12  ;;  %868 = vmatprep.mubr.bf16.mxu1 %v922_v13 }
  0x2e   : > { %853 = vmatmul.mubr.bf16.gmra.mrb[4].mxu0 %v915_v14  ;;  %869 = vmatmul.mubr.bf16.gmra.mrb[4].mxu1 %v923_v15 }
  0x2f   : > { %856 = vmatprep.mubr.bf16.mxu0 %v916_v16  ;;  %872 = vmatprep.mubr.bf16.mxu1 %v924_v17 }
  0x36   : > { %857 = vmatmul.mubr.bf16.gmra.mrb[8].mxu0 %v917_v18  ;;  %873 = vmatmul.mubr.bf16.gmra.mrb[8].mxu1 %v925_v19 }
  0x37   : > { %860 = vmatprep.mubr.bf16.mxu0 %v918_v20  ;;  %876 = vmatprep.mubr.bf16.mxu1 %v926_v21 }
  0x3e   : > { %861 = vmatmul.mubr.bf16.gmra.mrb[12].mxu0 %v919_v22  ;;  %877 = vmatmul.mubr.bf16.gmra.mrb[12].mxu1 %v927_v23 }
  0xf9   : > { %v850_v24 = vpop.f32.mrb[0].mxu0  ;;  %v1021_v25 = vpop.f32.mrb[0].mxu1 }
  0xfa   : > { %541 = vst [vmem:[%s1019_s11 + $0x10] sm:$0xff] %v850_v24  ;;  %v412_v26 = vpop.f32.mrb[1].mxu0  ;;  %557 = vst [vmem:[%s1019_s11 + $0x90] sm:$0xff] %v1021_v25  ;;  %v1026_v27 = vpop.f32.mrb[1].mxu1  ;;  %v610_v35 = vmul.f32 %v850_v24, %v850_v24 }
  0xfb   : > { %539 = vst [vmem:[%s1019_s11] sm:$0xff] %v412_v26  ;;  %v851_v28 = vpop.f32.mrb[2].mxu0  ;;  %555 = vst [vmem:[%s1019_s11 + $0x80] sm:$0xff] %v1026_v27  ;;  %v1031_v29 = vpop.f32.mrb[2].mxu1  ;;  %v608_v32 = vmul.f32 %v412_v26, %v412_v26 }
  0xfc   : > { %542 = vst [vmem:[%s1019_s11 + $0x18] sm:$0xff] %v851_v28  ;;  %v415_v30 = vpop.f32.mrb[3].mxu0  ;;  %558 = vst [vmem:[%s1019_s11 + $0x98] sm:$0xff] %v1031_v29  ;;  %v1036_v31 = vpop.f32.mrb[3].mxu1  ;;  %v611_v38 = vmul.f32 %v851_v28, %v851_v28 }
  0xfd   : > { %540 = vst [vmem:[%s1019_s11 + $0x8] sm:$0xff] %v415_v30  ;;  %v571_v33 = vadd.f32 %v415_v30, %v412_v26  ;;  %v609_v34 = vmul.f32 %v415_v30, %v415_v30  ;;  %556 = vst [vmem:[%s1019_s11 + $0x88] sm:$0xff] %v1036_v31 }
  0xff   : > { %v572_v36 = vadd.f32 %v850_v24, %v571_v33  ;;  %v640_v37 = vadd.f32 %v609_v34, %v608_v32 }
 0x101   : > { %v641_v39 = vadd.f32 %v640_v37, %v610_v35  ;;  %v854_v40 = vpop.f32.mrb[4].mxu0  ;;  %v573_v41 = vadd.f32 %v851_v28, %v572_v36  ;;  %v1041_v42 = vpop.f32.mrb[4].mxu1 }
 0x102   : > { %545 = vst [vmem:[%s1019_s11 + $0x30] sm:$0xff] %v854_v40  ;;  %v428_v43 = vpop.f32.mrb[5].mxu0  ;;  %561 = vst [vmem:[%s1019_s11 + $0xb0] sm:$0xff] %v1041_v42  ;;  %v1046_v44 = vpop.f32.mrb[5].mxu1  ;;  %v614_v55 = vmul.f32 %v854_v40, %v854_v40 }
 0x103   : > { %543 = vst [vmem:[%s1019_s11 + $0x20] sm:$0xff] %v428_v43  ;;  %v574_v45 = vadd.f32 %v573_v41, %v428_v43  ;;  %v612_v46 = vmul.f32 %v428_v43, %v428_v43  ;;  %v642_v47 = vadd.f32 %v641_v39, %v611_v38  ;;  %v855_v48 = vpop.f32.mrb[6].mxu0  ;;  %559 = vst [vmem:[%s1019_s11 + $0xa0] sm:$0xff] %v1046_v44  ;;  %v1051_v49 = vpop.f32.mrb[6].mxu1 }
 0x104   : > { %546 = vst [vmem:[%s1019_s11 + $0x38] sm:$0xff] %v855_v48  ;;  %v431_v50 = vpop.f32.mrb[7].mxu0  ;;  %562 = vst [vmem:[%s1019_s11 + $0xb8] sm:$0xff] %v1051_v49  ;;  %v1056_v51 = vpop.f32.mrb[7].mxu1  ;;  %v615_v58 = vmul.f32 %v855_v48, %v855_v48  ;;  %v624_v41 = vmul.f32 %v1026_v27, %v1026_v27 }
 0x105   : > { %v643_v52 = vadd.f32 %v642_v47, %v612_v46  ;;  %544 = vst [vmem:[%s1019_s11 + $0x28] sm:$0xff] %v431_v50  ;;  %v575_v53 = vadd.f32 %v574_v45, %v431_v50  ;;  %v613_v54 = vmul.f32 %v431_v50, %v431_v50  ;;  %560 = vst [vmem:[%s1019_s11 + $0xa8] sm:$0xff] %v1056_v51 }
 0x106   : > { %v626_v50 = vmul.f32 %v1021_v25, %v1021_v25 }
 0x107   : > { %v576_v56 = vadd.f32 %v854_v40, %v575_v53  ;;  %v644_v57 = vadd.f32 %v643_v52, %v613_v54  ;;  %v627_v54 = vmul.f32 %v1031_v29, %v1031_v29 }
 0x109   : > { %v645_v59 = vadd.f32 %v644_v57, %v614_v55  ;;  %v858_v60 = vpop.f32.mrb[8].mxu0  ;;  %v577_v61 = vadd.f32 %v855_v48, %v576_v56  ;;  %v1061_v62 = vpop.f32.mrb[8].mxu1  ;;  %v625_v48 = vmul.f32 %v1036_v31, %v1036_v31 }
 0x10a   : > { %549 = vst [vmem:[%s1019_s11 + $0x50] sm:$0xff] %v858_v60  ;;  %v444_v63 = vpop.f32.mrb[9].mxu0  ;;  %565 = vst [vmem:[%s1019_s11 + $0xd0] sm:$0xff] %v1061_v62  ;;  %v1066_v0 = vpop.f32.mrb[9].mxu1  ;;  %v618_v11 = vmul.f32 %v858_v60, %v858_v60 }
 0x10b   : > { %547 = vst [vmem:[%s1019_s11 + $0x40] sm:$0xff] %v444_v63  ;;  %v578_v1 = vadd.f32 %v577_v61, %v444_v63  ;;  %v616_v2 = vmul.f32 %v444_v63, %v444_v63  ;;  %v646_v3 = vadd.f32 %v645_v59, %v615_v58  ;;  %v859_v4 = vpop.f32.mrb[10].mxu0  ;;  %563 = vst [vmem:[%s1019_s11 + $0xc0] sm:$0xff] %v1066_v0  ;;  %v1071_v5 = vpop.f32.mrb[10].mxu1 }
 0x10c   : > { %550 = vst [vmem:[%s1019_s11 + $0x58] sm:$0xff] %v859_v4  ;;  %v447_v6 = vpop.f32.mrb[11].mxu0  ;;  %566 = vst [vmem:[%s1019_s11 + $0xd8] sm:$0xff] %v1071_v5  ;;  %v1076_v7 = vpop.f32.mrb[11].mxu1  ;;  %v619_v14 = vmul.f32 %v859_v4, %v859_v4 }
 0x10d   : > { %v647_v8 = vadd.f32 %v646_v3, %v616_v2  ;;  %548 = vst [vmem:[%s1019_s11 + $0x48] sm:$0xff] %v447_v6  ;;  %v579_v9 = vadd.f32 %v578_v1, %v447_v6  ;;  %v617_v10 = vmul.f32 %v447_v6, %v447_v6  ;;  %564 = vst [vmem:[%s1019_s11 + $0xc8] sm:$0xff] %v1076_v7 }
 0x10f   : > { %v580_v12 = vadd.f32 %v858_v60, %v579_v9  ;;  %v648_v13 = vadd.f32 %v647_v8, %v617_v10  ;;  %v629_v60 = vmul.f32 %v1056_v51, %v1056_v51  ;;  %v633_v8 = vmul.f32 %v1076_v7, %v1076_v7 }
 0x111   : > { %v649_v15 = vadd.f32 %v648_v13, %v618_v11  ;;  %v862_v16 = vpop.f32.mrb[12].mxu0  ;;  %v581_v17 = vadd.f32 %v859_v4, %v580_v12  ;;  %v1081_v18 = vpop.f32.mrb[12].mxu1 }
 0x112   : > { %553 = vst [vmem:[%s1019_s11 + $0x70] sm:$0xff] %v862_v16  ;;  %v460_v19 = vpop.f32.mrb[13].mxu0  ;;  %569 = vst [vmem:[%s1019_s11 + $0xf0] sm:$0xff] %v1081_v18  ;;  %v524_v20 = vpop.f32.mrb[13].mxu1  ;;  %v622_v35 = vmul.f32 %v862_v16, %v862_v16 }
 0x113   : > { %551 = vst [vmem:[%s1019_s11 + $0x60] sm:$0xff] %v460_v19  ;;  %v582_v21 = vadd.f32 %v581_v17, %v460_v19  ;;  %v620_v22 = vmul.f32 %v460_v19, %v460_v19  ;;  %v650_v23 = vadd.f32 %v649_v15, %v619_v14  ;;  %v863_v24 = vpop.f32.mrb[14].mxu0  ;;  %567 = vst [vmem:[%s1019_s11 + $0xe0] sm:$0xff] %v524_v20  ;;  %v879_v26 = vpop.f32.mrb[14].mxu1 }
 0x114   : > { %554 = vst [vmem:[%s1019_s11 + $0x78] sm:$0xff] %v863_v24  ;;  %v463_v28 = vpop.f32.mrb[15].mxu0  ;;  %570 = vst [vmem:[%s1019_s11 + $0xf8] sm:$0xff] %v879_v26  ;;  %v527_v30 = vpop.f32.mrb[15].mxu1  ;;  %v623_v38 = vmul.f32 %v863_v24, %v863_v24 }
 0x115   : > { %v651_v32 = vadd.f32 %v650_v23, %v620_v22  ;;  %552 = vst [vmem:[%s1019_s11 + $0x68] sm:$0xff] %v463_v28  ;;  %v583_v33 = vadd.f32 %v582_v21, %v463_v28  ;;  %v621_v34 = vmul.f32 %v463_v28, %v463_v28  ;;  %568 = vst [vmem:[%s1019_s11 + $0xe8] sm:$0xff] %v527_v30 }
 0x116   : > { %v637_v17 = vmul.f32 %v527_v30, %v527_v30  ;;  %v639_v21 = vmul.f32 %v879_v26, %v879_v26 }
 0x117   : > { %v584_v36 = vadd.f32 %v862_v16, %v583_v33  ;;  %v652_v37 = vadd.f32 %v651_v32, %v621_v34 }
 0x119   : > { %v653_v39 = vadd.f32 %v652_v37, %v622_v35  ;;  %v585_v40 = vadd.f32 %v863_v24, %v584_v36 }
 0x11b   : > { %v586_v43 = vadd.f32 %v585_v40, %v1026_v27  ;;  %v654_v45 = vadd.f32 %v653_v39, %v623_v38  ;;  %v628_v27 = vmul.f32 %v1046_v44, %v1046_v44 }
 0x11d   : > { %v655_v46 = vadd.f32 %v654_v45, %v624_v41  ;;  %v587_v47 = vadd.f32 %v586_v43, %v1036_v31 }
 0x11f   : > { %v588_v52 = vadd.f32 %v1021_v25, %v587_v47  ;;  %v656_v53 = vadd.f32 %v655_v46, %v625_v48  ;;  %v630_v25 = vmul.f32 %v1041_v42, %v1041_v42 }
 0x121   : > { %v657_v55 = vadd.f32 %v656_v53, %v626_v50  ;;  %v589_v56 = vadd.f32 %v1031_v29, %v588_v52  ;;  %v631_v29 = vmul.f32 %v1051_v49, %v1051_v49 }
 0x123   : > { %v590_v57 = vadd.f32 %v589_v56, %v1046_v44  ;;  %v658_v58 = vadd.f32 %v657_v55, %v627_v54  ;;  %v632_v44 = vmul.f32 %v1066_v0, %v1066_v0 }
 0x125   : > { %v659_v59 = vadd.f32 %v658_v58, %v628_v27  ;;  %v591_v31 = vadd.f32 %v590_v57, %v1056_v51 }
 0x127   : > { %v592_v61 = vadd.f32 %v1041_v42, %v591_v31  ;;  %v660_v63 = vadd.f32 %v659_v59, %v629_v60  ;;  %v634_v42 = vmul.f32 %v1061_v62, %v1061_v62 }
 0x129   : > { %v661_v1 = vadd.f32 %v660_v63, %v630_v25  ;;  %v593_v2 = vadd.f32 %v1051_v49, %v592_v61  ;;  %v635_v49 = vmul.f32 %v1071_v5, %v1071_v5 }
 0x12b   : > { %v594_v3 = vadd.f32 %v593_v2, %v1066_v0  ;;  %v662_v4 = vadd.f32 %v661_v1, %v631_v29  ;;  %v636_v0 = vmul.f32 %v524_v20, %v524_v20 }
 0x12d   : > { %v663_v6 = vadd.f32 %v662_v4, %v632_v44  ;;  %v595_v51 = vadd.f32 %v594_v3, %v1076_v7  ;;  %v638_v7 = vmul.f32 %v1081_v18, %v1081_v18 }
 0x12f   : > { %v596_v9 = vadd.f32 %v1061_v62, %v595_v51  ;;  %v664_v10 = vadd.f32 %v663_v6, %v633_v8 }
 0x131   : > { %v665_v11 = vadd.f32 %v664_v10, %v634_v42  ;;  %v597_v12 = vadd.f32 %v1071_v5, %v596_v9 }
 0x133   : > { %v598_v13 = vadd.f32 %v597_v12, %v524_v20  ;;  %v666_v14 = vadd.f32 %v665_v11, %v635_v49  ;;  %v677_v20 = vlaneseq }
 0x135   : > { %v667_v15 = vadd.f32 %v666_v14, %v636_v0  ;;  %v599_v16 = vadd.f32 %v598_v13, %v527_v30  ;;  %v678_v36 = vshrl.u32 %v677_v20, 7 }
 0x137   : > { %v600_v62 = vadd.f32 %v1081_v18, %v599_v16  ;;  %v668_v19 = vadd.f32 %v667_v15, %v637_v17  ;;  %vm679_vm0 = vcmp.eq.s32.totalorder %v678_v36, 0  ;;  %vm681_vm1 = vcmp.eq.s32.totalorder %v678_v36, 1 }
 0x139   : > { %v601_v22 = vadd.f32 %v879_v26, %v600_v62  ;;  %v669_v23 = vadd.f32 %v668_v19, %v638_v7 }
 0x13b   : > { %v602_v24 = vrot.slane %v601_v22, 4  ;;  %v670_v28 = vadd.f32 %v669_v23, %v639_v21 }
 0x13d   : > { %v603_v5 = vadd.f32 %v602_v24, %v601_v22  ;;  %v671_v32 = vrot.slane %v670_v28, 4 }
 0x13f   : > { %v604_v33 = vrot.slane %v603_v5, 2  ;;  %v672_v34 = vadd.f32 %v671_v32, %v670_v28 }
 0x141   : > { %v605_v35 = vadd.f32 %v604_v33, %v603_v5  ;;  %v673_v30 = vrot.slane %v672_v34, 2 }
 0x143   : > { %v606_v37 = vrot.slane %v605_v35, 1  ;;  %v674_v38 = vadd.f32 %v673_v30, %v672_v34 }
 0x145   : > { %v607_v39 = vadd.f32 %v606_v37, %v605_v35  ;;  %v675_v18 = vrot.slane %v674_v38, 1 }
 0x147   : > { %v676_v26 = vadd.f32 %v675_v18, %v674_v38  ;;  %v680_v40 = vsel %vm679_vm0, %v607_v39, 0.0 }
 0x149   : > { %v682_v41 = vsel %vm681_vm1, %v676_v26, 0.0 }
 0x14a   : > { %v683_v43 = vadd.f32 %v682_v41, %v680_v40 }
 0x14c   : > { %684 = vst [vmem:[%s184_s17] sm:$0xff] %v683_v43 }
 0x14d PF: > { %s14_s12 = sadd.s32 1, %s934_s12  }
 0x14e   : > { %p11_p5 = scmp.ge.s32.totalorder %s14_s12, 4  }
 0x150   :  { %13 = sbr.rel (!%p11_p5) target bundleno = 1 (0x1), region = 70 }

</bundles_post_ra>
